<compile_context>
chip_gen: v6e
topology: v6e:2x2x1
jax: 0.10.0
libtpu: 0.0.40
codegen_flags: <defaults>
</compile_context>

<pallas_src>
import functools

import jax
import jax.numpy as jnp
from jax import lax
from jax.experimental import pallas as pl
from jax.experimental.pallas import tpu as pltpu


def _lora_embed_kernel(ids_ref, a_ref, b_ref, emb_hbm, o_ref,
                       gather_buf, copy_sems, *, tq, scaling):
    # ids_ref:     (T_padded,)  int32 token ids in SMEM (scalar prefetch)
    # a_ref:       (tq, R)      gathered lora_A rows for this token block
    # b_ref:       (R, D)       full lora_B, resident every step
    # emb_hbm:     (V, D)       embedding table, raw HBM ref (pl.ANY)
    # o_ref:       (tq, D)      output block
    # gather_buf:  (2, tq, D)   double-buffered VMEM gather scratch
    # copy_sems:   (2,)         DMA semaphores, one per buffer slot
    t = pl.program_id(0)
    nblk = pl.num_programs(0)
    slot = lax.rem(t, 2)

    def issue_gather(block_idx, slot_idx):
        base = block_idx * tq

        @pl.loop(0, tq)
        def _(r):
            row = ids_ref[base + r]
            pltpu.make_async_copy(
                emb_hbm.at[pl.ds(row, 1)],                 # (1, D) HBM row
                gather_buf.at[slot_idx, pl.ds(r, 1)],      # (1, D) VMEM row
                copy_sems.at[slot_idx],
            ).start()

    def wait_gather(slot_idx):
        # One wait per issued copy; descriptor only needs matching shape.
        @pl.loop(0, tq)
        def _(r):
            pltpu.make_async_copy(
                emb_hbm.at[pl.ds(0, 1)],
                gather_buf.at[slot_idx, pl.ds(0, 1)],
                copy_sems.at[slot_idx],
            ).wait()

    # Prime the pipeline on the first step.
    @pl.when(t == 0)
    def _():
        issue_gather(0, 0)

    # Wait for the current block's rows.
    wait_gather(slot)

    # Prefetch next block's rows into the other slot while we compute.
    @pl.when(t + 1 < nblk)
    def _():
        issue_gather(t + 1, 1 - slot)

    rows = gather_buf[slot]                                   # (tq, D)
    lora = jnp.dot(a_ref[...], b_ref[...],
                   preferred_element_type=jnp.float32)        # (tq, D) on MXU
    o_ref[...] = (rows.astype(jnp.float32)
                  + scaling * lora).astype(o_ref.dtype)


@functools.partial(jax.jit, static_argnames=("scaling", "tq"))
def lora_embedding_forward(ids, emb_weight, lora_A, lora_B, *, scaling, tq=128):
    """ids: (B, S) int; returns (B, S, D) = emb[ids] + scaling * lora_A[ids] @ lora_B."""
    B, S = ids.shape
    V, D = emb_weight.shape
    _, R = lora_A.shape
    T = B * S
    nblk = pl.cdiv(T, tq)
    Tp = nblk * tq

    # Clamp (untrusted ids must never drive an OOB HBM DMA) and pad to a whole
    # number of TQ-token blocks; padded slots gather row 0 and are sliced off.
    ids_flat = jnp.clip(ids.reshape(T).astype(jnp.int32), 0, V - 1)
    ids_pad = jnp.pad(ids_flat, (0, Tp - T))

    # lora_A gather is tiny (T x R): do it densely in the wrapper instead of
    # issuing 32-byte per-token DMAs inside the kernel.
    a_gathered = jnp.take(lora_A, ids_pad, axis=0)            # (Tp, R)

    grid_spec = pltpu.PrefetchScalarGridSpec(
        num_scalar_prefetch=1,
        grid=(nblk,),
        in_specs=[
            pl.BlockSpec((tq, R), lambda t, ids: (t, 0)),     # gathered lora_A rows
            pl.BlockSpec((R, D), lambda t, ids: (0, 0)),      # full lora_B (resident)
            pl.BlockSpec(memory_space=pl.ANY),                # embedding table in HBM
        ],
        out_specs=pl.BlockSpec((tq, D), lambda t, ids: (t, 0)),
        scratch_shapes=[
            pltpu.VMEM((2, tq, D), emb_weight.dtype),         # double-buffered gather
            pltpu.SemaphoreType.DMA((2,)),
        ],
    )

    kernel = functools.partial(_lora_embed_kernel, tq=tq, scaling=float(scaling))

    out_pad = pl.pallas_call(
        kernel,
        out_shape=jax.ShapeDtypeStruct((Tp, D), emb_weight.dtype),
        grid_spec=grid_spec,
        compiler_params=pltpu.CompilerParams(
            # Cross-step DMA prefetch carries state between grid iterations,
            # so the token axis must stay sequential.
            dimension_semantics=("arbitrary",),
        ),
    )(ids_pad, a_gathered, lora_B, emb_weight)

    return out_pad[:T].reshape(B, S, D)


if __name__ == "__main__":
    # Small, deterministic problem sizes (multiple grid steps + padding path).
    batch, seq = 2, 100
    num_embeddings = 64          # vocab size
    embedding_dim = 128          # lane-dense output (multiple of 128)
    rank = 8
    alpha = 16.0
    scaling = alpha / rank
    padding_idx = 0

    key = jax.random.PRNGKey(0)
    k_w, k_a, k_b, k_ids = jax.random.split(key, 4)

    emb_weight = jax.random.normal(k_w, (num_embeddings, embedding_dim),
                                   dtype=jnp.float32)
    # nn.Embedding zeroes the padding_idx row at init; mimic that.
    emb_weight = emb_weight.at[padding_idx].set(0.0)

    # lora_A ~ kaiming-uniform-ish; per the module lora_B is zero-initialized,
    # but we use small nonzero values so the LoRA matmul path is exercised.
    # Values are rounded to the bf16 grid so the MXU matmul in the kernel and
    # the XLA matmul in the reference agree to f32 accuracy.
    lora_A = jax.random.uniform(k_a, (num_embeddings, rank),
                                dtype=jnp.float32, minval=-0.5, maxval=0.5)
    lora_A = lora_A.astype(jnp.bfloat16).astype(jnp.float32)
    lora_A = lora_A.at[padding_idx].set(0.0)
    lora_B = (0.05 * jax.random.normal(k_b, (rank, embedding_dim),
                                       dtype=jnp.float32))
    lora_B = lora_B.astype(jnp.bfloat16).astype(jnp.float32)

    ids = jax.random.randint(k_ids, (batch, seq), 0, num_embeddings,
                             dtype=jnp.int32)

    out = lora_embedding_forward(ids, emb_weight, lora_A, lora_B,
                                 scaling=scaling)
    out = jax.block_until_ready(out)

    # Pure-JAX reference of the PyTorch un-merged forward.
    ref = emb_weight[ids] + scaling * (lora_A[ids] @ lora_B)

    assert out.shape == (batch, seq, embedding_dim)
    assert jnp.allclose(out, ref, atol=1e-4, rtol=1e-4), "mismatch vs reference"
    print("KERNEL_OK")
</pallas_src>

<mosaic_0001>
module attributes {stable_mosaic.version = 11 : i64} {
  func.func @_lora_embed_kernel(%arg0: i32, %arg1: memref<256xi32, #tpu.memory_space<smem>>, %arg2: memref<128x8xf32, #tpu.memory_space<vmem>>, %arg3: memref<8x128xf32, #tpu.memory_space<vmem>>, %arg4: memref<64x128xf32, #tpu.memory_space<any>>, %arg5: memref<128x128xf32, #tpu.memory_space<vmem>>, %arg6: memref<2x128x128xf32, #tpu.memory_space<vmem>>, %arg7: memref<2x!tpu.dma_semaphore, #tpu.memory_space<semaphore_mem>>) attributes {dimension_semantics = [#tpu.dimension_semantics<arbitrary>], iteration_bounds = array<i64: 2>, scalar_prefetch = 1 : i64, scratch_operands = 2 : i64, tpu.core_type = #tpu.core_type<tc>, window_params = [{transform_indices = @transform_0, window_bounds = array<i64: 128, 8>}, {pipeline_mode = #tpu.pipeline_mode<synchronous>, transform_indices = @transform_1, window_bounds = array<i64: 8, 128>}, {}, {transform_indices = @transform_3, window_bounds = array<i64: 128, 128>}]} {
    %c2_i32 = arith.constant 2 : i32
    %0 = arith.remsi %arg0, %c2_i32 : i32
    %c0_i32 = arith.constant 0 : i32
    %1 = arith.cmpi eq, %arg0, %c0_i32 : i32
    %2 = arith.extui %1 : i1 to i32
    %c0_i32_0 = arith.constant 0 : i32
    %3 = arith.cmpi ne, %2, %c0_i32_0 : i32
    scf.if %3 {
      %c0_i32_13 = arith.constant 0 : i32
      %c128_i32_14 = arith.constant 128 : i32
      %19 = arith.addi %c0_i32_13, %c128_i32_14 : i32
      %c1_i32_15 = arith.constant 1 : i32
      scf.for %arg8 = %c0_i32_13 to %19 step %c1_i32_15  : i32 {
        %c1_i32_17 = arith.constant 1 : i32
        %20 = arith.muli %arg8, %c1_i32_17 : i32
        %c0_i32_18 = arith.constant 0 : i32
        %21 = arith.addi %c0_i32_18, %20 : i32
        %c0_i32_19 = arith.constant 0 : i32
        %22 = arith.addi %c0_i32_19, %21 : i32
        %23 = arith.index_cast %22 : i32 to index
        %24 = memref.load %arg1[%23] : memref<256xi32, #tpu.memory_space<smem>>
        %c0_i32_20 = arith.constant 0 : i32
        %c0_i32_21 = arith.constant 0 : i32
        %c0_i32_22 = arith.constant 0 : i32
        %25 = tpu.memref_slice %arg4[%24, %c0_i32_22] : memref<64x128xf32, #tpu.memory_space<any>> -> memref<1x128xf32, #tpu.memory_space<any>>
        %c0_i32_23 = arith.constant 0 : i32
        %26 = tpu.memref_slice %arg6[%c0_i32_20, %21, %c0_i32_23] : memref<2x128x128xf32, #tpu.memory_space<vmem>> -> memref<1x1x128xf32, #tpu.memory_space<vmem>>
        %27 = tpu.memref_squeeze %26 : memref<1x1x128xf32, #tpu.memory_space<vmem>> -> memref<1x128xf32, #tpu.memory_space<vmem>>
        %28 = tpu.memref_slice %arg7[%c0_i32_21] : memref<2x!tpu.dma_semaphore, #tpu.memory_space<semaphore_mem>> -> memref<1x!tpu.dma_semaphore, #tpu.memory_space<semaphore_mem>>
        %29 = tpu.memref_squeeze %28 : memref<1x!tpu.dma_semaphore, #tpu.memory_space<semaphore_mem>> -> memref<!tpu.dma_semaphore, #tpu.memory_space<semaphore_mem>>
        tpu.enqueue_dma source(%25 : memref<1x128xf32, #tpu.memory_space<any>>) target(%27 : memref<1x128xf32, #tpu.memory_space<vmem>>) target_semaphore(%29 : memref<!tpu.dma_semaphore, #tpu.memory_space<semaphore_mem>>)
      }
      %c128_i32_16 = arith.constant 128 : i32
    } else {
    }
    %c0_i32_1 = arith.constant 0 : i32
    %c128_i32 = arith.constant 128 : i32
    %4 = arith.addi %c0_i32_1, %c128_i32 : i32
    %c1_i32 = arith.constant 1 : i32
    scf.for %arg8 = %c0_i32_1 to %4 step %c1_i32  : i32 {
      %c0_i32_13 = arith.constant 0 : i32
      %c0_i32_14 = arith.constant 0 : i32
      %19 = tpu.memref_slice %arg4[%c0_i32_13, %c0_i32_14] : memref<64x128xf32, #tpu.memory_space<any>> -> memref<1x128xf32, #tpu.memory_space<any>>
      %c0_i32_15 = arith.constant 0 : i32
      %c0_i32_16 = arith.constant 0 : i32
      %20 = tpu.memref_slice %arg6[%0, %c0_i32_15, %c0_i32_16] : memref<2x128x128xf32, #tpu.memory_space<vmem>> -> memref<1x1x128xf32, #tpu.memory_space<vmem>>
      %21 = tpu.memref_squeeze %20 : memref<1x1x128xf32, #tpu.memory_space<vmem>> -> memref<1x128xf32, #tpu.memory_space<vmem>>
      %22 = tpu.memref_slice %arg7[%0] : memref<2x!tpu.dma_semaphore, #tpu.memory_space<semaphore_mem>> -> memref<1x!tpu.dma_semaphore, #tpu.memory_space<semaphore_mem>>
      %23 = tpu.memref_squeeze %22 : memref<1x!tpu.dma_semaphore, #tpu.memory_space<semaphore_mem>> -> memref<!tpu.dma_semaphore, #tpu.memory_space<semaphore_mem>>
      tpu.wait_dma2 semaphore(%23 : memref<!tpu.dma_semaphore, #tpu.memory_space<semaphore_mem>>) src(%19 : memref<1x128xf32, #tpu.memory_space<any>>) dst(%21 : memref<1x128xf32, #tpu.memory_space<vmem>>)
    }
    %c1_i32_2 = arith.constant 1 : i32
    %5 = arith.addi %arg0, %c1_i32_2 : i32
    %c2_i32_3 = arith.constant 2 : i32
    %6 = arith.cmpi slt, %5, %c2_i32_3 : i32
    %7 = arith.extui %6 : i1 to i32
    %c0_i32_4 = arith.constant 0 : i32
    %8 = arith.cmpi ne, %7, %c0_i32_4 : i32
    scf.if %8 {
      %c1_i32_13 = arith.constant 1 : i32
      %19 = arith.addi %arg0, %c1_i32_13 : i32
      %c1_i32_14 = arith.constant 1 : i32
      %20 = arith.subi %c1_i32_14, %0 : i32
      %c128_i32_15 = arith.constant 128 : i32
      %21 = arith.muli %19, %c128_i32_15 : i32
      %c0_i32_16 = arith.constant 0 : i32
      %c128_i32_17 = arith.constant 128 : i32
      %22 = arith.addi %c0_i32_16, %c128_i32_17 : i32
      %c1_i32_18 = arith.constant 1 : i32
      scf.for %arg8 = %c0_i32_16 to %22 step %c1_i32_18  : i32 {
        %c1_i32_20 = arith.constant 1 : i32
        %23 = arith.muli %arg8, %c1_i32_20 : i32
        %c0_i32_21 = arith.constant 0 : i32
        %24 = arith.addi %c0_i32_21, %23 : i32
        %25 = arith.addi %21, %24 : i32
        %26 = arith.index_cast %25 : i32 to index
        %27 = memref.load %arg1[%26] : memref<256xi32, #tpu.memory_space<smem>>
        %c0_i32_22 = arith.constant 0 : i32
        %28 = tpu.memref_slice %arg4[%27, %c0_i32_22] : memref<64x128xf32, #tpu.memory_space<any>> -> memref<1x128xf32, #tpu.memory_space<any>>
        %c0_i32_23 = arith.constant 0 : i32
        %29 = tpu.memref_slice %arg6[%20, %24, %c0_i32_23] : memref<2x128x128xf32, #tpu.memory_space<vmem>> -> memref<1x1x128xf32, #tpu.memory_space<vmem>>
        %30 = tpu.memref_squeeze %29 : memref<1x1x128xf32, #tpu.memory_space<vmem>> -> memref<1x128xf32, #tpu.memory_space<vmem>>
        %31 = tpu.memref_slice %arg7[%20] : memref<2x!tpu.dma_semaphore, #tpu.memory_space<semaphore_mem>> -> memref<1x!tpu.dma_semaphore, #tpu.memory_space<semaphore_mem>>
        %32 = tpu.memref_squeeze %31 : memref<1x!tpu.dma_semaphore, #tpu.memory_space<semaphore_mem>> -> memref<!tpu.dma_semaphore, #tpu.memory_space<semaphore_mem>>
        tpu.enqueue_dma source(%28 : memref<1x128xf32, #tpu.memory_space<any>>) target(%30 : memref<1x128xf32, #tpu.memory_space<vmem>>) target_semaphore(%32 : memref<!tpu.dma_semaphore, #tpu.memory_space<semaphore_mem>>)
      }
      %c128_i32_19 = arith.constant 128 : i32
    } else {
    }
    %9 = arith.index_cast %0 : i32 to index
    %c0 = arith.constant 0 : index
    %c0_5 = arith.constant 0 : index
    %10 = vector.load %arg6[%9, %c0, %c0_5] : memref<2x128x128xf32, #tpu.memory_space<vmem>>, vector<1x128x128xf32>
    %11 = vector.shape_cast %10 : vector<1x128x128xf32> to vector<128x128xf32>
    %c0_6 = arith.constant 0 : index
    %c0_7 = arith.constant 0 : index
    %12 = vector.load %arg2[%c0_6, %c0_7] : memref<128x8xf32, #tpu.memory_space<vmem>>, vector<128x8xf32>
    %c0_8 = arith.constant 0 : index
    %c0_9 = arith.constant 0 : index
    %13 = vector.load %arg3[%c0_8, %c0_9] : memref<8x128xf32, #tpu.memory_space<vmem>>, vector<8x128xf32>
    %cst = arith.constant dense<0.000000e+00> : vector<128x128xf32>
    %14 = tpu.matmul %12, %13, %cst {dimension_numbers = #tpu.dot_dimension_numbers<[1], [0], [0], [1], [0, 0, 1, 1], [], []>} : vector<128x8xf32>, vector<8x128xf32>, vector<128x128xf32> -> vector<128x128xf32>
    %cst_10 = arith.constant 2.000000e+00 : f32
    %15 = vector.broadcast %cst_10 : f32 to vector<128x128xf32>
    %16 = arith.mulf %15, %14 : vector<128x128xf32>
    %17 = arith.addf %11, %16 : vector<128x128xf32>
    %c0_11 = arith.constant 0 : index
    %c0_12 = arith.constant 0 : index
    %18 = vector.load %arg5[%c0_11, %c0_12] : memref<128x128xf32, #tpu.memory_space<vmem>>, vector<128x128xf32>
    tpu.vector_store %arg5[%c0_11, %c0_12], %17 {strides = array<i32>} : memref<128x128xf32, #tpu.memory_space<vmem>>, vector<128x128xf32>,
    return
  }
  func.func @transform_0(%arg0: i32, %arg1: memref<256xi32, #tpu.memory_space<smem>>) -> (i32, i32) {
    %c0_i32 = arith.constant 0 : i32
    %c0_i32_0 = arith.constant 0 : i32
    return %arg0, %c0_i32 : i32, i32
  }
  func.func @transform_1(%arg0: i32, %arg1: memref<256xi32, #tpu.memory_space<smem>>) -> (i32, i32) {
    %c0_i32 = arith.constant 0 : i32
    %c0_i32_0 = arith.constant 0 : i32
    %c0_i32_1 = arith.constant 0 : i32
    return %c0_i32, %c0_i32_0 : i32, i32
  }
  func.func @transform_3(%arg0: i32, %arg1: memref<256xi32, #tpu.memory_space<smem>>) -> (i32, i32) {
    %c0_i32 = arith.constant 0 : i32
    %c0_i32_0 = arith.constant 0 : i32
    return %arg0, %c0_i32 : i32, i32
  }
}

</mosaic_0001>

<bundles_post_ra>
// kernel: lora_embedding_forward.1
= control target key start
LH: loop header
LB: loop body
LE: loop exit
PB: predicated region body
PF: predicated region fallthrough
CT: control target
= control target key end

     0   :  { %s989_s0 = inlined_call_operand.vmem [shape: s32[256], index: 0, kind: input, shape index: {}]   ;;  %s990_s1 = inlined_call_operand.vmem [shape: f32[256,8], index: 1, kind: input, shape index: {}]   ;;  %s991_s2 = inlined_call_operand.vmem [shape: f32[8,128], index: 2, kind: input, shape index: {}]   ;;  %s992_s3 = inlined_call_operand.vmem [shape: f32[64,128], index: 3, kind: input, shape index: {}]   ;;  %s993_s4 = inlined_call_operand.vmem [shape: f32[256,128], index: 4, kind: output, shape index: {}]  }
   0x1   :  { %s9_s17 = sshll.u32 %s989_s0, 4  ;;  %s10_s17 = int_to_ptr.vmem [resolvable:$true] %s9_s17 }
   0x2   :  { %s802_s18 = scalar_lea.vmem %s10_s17, 32  ;;  %p807_p1 = scmp.lt.s32.totalorder %s10_s17, %s10_s17 }
   0x3   :  { %p803_p0 = scmp.ne.s32.totalorder %s10_s17, %s802_s18  ;;  %p808_p2 = scmp.lt.s32.totalorder %s802_s18, %s802_s18 }
   0x5   :  { %p809_p3 = por %p808_p2, %p807_p1 }
   0x7   :  { %p810_p4 = pnand %p809_p3, %p803_p0 }
   0x9   :  { %813 = shalt.err (!%p810_p4)  }
   0xa   :  { %s850_s19 = smov [#allocation5]  }
   0xb   :  { %12 = dma.vmem_to_smem %s10_s17, 32, %s850_s19, [#allocation4] }
   0xc   :  { %830 = dma.done.wait [#allocation4], 32 }
   0xd   :  { %831 = vsyncadd [#allocation4], 4294967264 }
   0xe   :  { %14 = sfence }
   0xf   :  { %s879_s20 = smov 0  }
  0x10 LB: > { %s885_s0 = sadd.s32 4294967295, %s836_s20   ;;  %p691_p5 = scmp.ge.s32.totalorder %s836_s20, 1  ;;  %s836_s20 = sphi %s879_s20, %s20_s20  }
  0x11   : > { %p121_p6 = scmp.lt.s32.totalorder %s836_s20, 3 }
  0x13   : > { %p122_p7 = pnand %p691_p5, %p121_p6 }
  0x14   : > { %s692_s21 = sshll.u32 (!%p122_p7), %s885_s0, 4  ;;  %s156_s22 = ssub.s32 (!%p122_p7), 0, %s885_s0 }
  0x15   : > { %125 = sbr.rel (%p122_p7) target bundleno = 299 (0x12b), region = 28  ;;  %p144_p8 = scmp.lt.s32.totalorder (!%p122_p7), %s692_s21, 31 }
  0x16   : > { %p155_p9 = scmp.lt.s32.totalorder (!%p122_p7), %s885_s0, 0  ;;  %s696_s23 = smin.u32 (!%p122_p7), %s885_s0, %s156_s22 }
  0x17   : > { %s158_s24 = sand.u32 (!%p122_p7), 1, %s696_s23   ;;  %p697_p10 = scmp.ne.s32.totalorder (!%p122_p7), %s885_s0, 0 }
  0x18   : > { %s159_s26 = ssub.s32 (!%p122_p7), 0, %s158_s24 }
  0x1a   : > { %s995_s21 = smov (!%p144_p8, %s692_s21), 31  ;;  %s997_s26 = smov (!%p155_p9, %s159_s26), %s158_s24 }
  0x1b   : > { %s693_s25 = sshll.u32 %s995_s21, 3  ;;  %164 = sbr.rel (%p697_p10) target bundleno = 49 (0x31), region = 32 }
  0x1c   : > { %s896_s29 = scalar_lea.vmem %s990_s1, %s693_s25  ;;  %s901_s6 = scalar_lea.vmem %s993_s4, %s693_s25 }
  0x1d   : > { %s838_s7 = smov (!%p697_p10), 0  }
  0x20 LB: >> { %s171_s8 = sld [smem:[#allocation5 + %s840_s7]]  ;;  %s173_s12 = scalar_lea.vmem [#allocation2], %s840_s7  ;;  %s840_s7 = sphi %s838_s7, %s170_s7  }
  0x26   : >> { %s172_s11 = scalar_lea.vmem %s992_s3, %s171_s8 }
  0x27   : >> { %v192_v0 = vld [vmem:[%s172_s11] sm:$0x1] }
  0x28   : >> { %193 = vst [vmem:[%s173_s12] sm:$0x1] %v192_v0 }
  0x29   : >> { %219 = vsyncadd [#allocation3], 16  ;;  %s170_s7 = sadd.s32 1, %s840_s7  }
  0x2a   : >> { %p167_p11 = scmp.ge.s32.totalorder %s170_s7, 128  }
  0x2c   : > { %169 = sbr.rel (!%p167_p11) target bundleno = 32 (0x20), region = 175 }
  0x31 PF: > { %s842_s13 = smov 0  }
  0x32 LB: >> { %s226_s14 = scalar_lea.sflag [#allocation3], %s997_s26  ;;  %s844_s13 = sphi %s842_s13, %s225_s13  }
  0x33   : >> { %832 = dma.done.wait %s226_s14, 16 }
  0x34   : >> { %833 = vsyncadd %s226_s14, 4294967280  ;;  %s225_s13 = sadd.s32 1, %s844_s13  }
  0x35   : >> { %p222_p12 = scmp.ge.s32.totalorder %s225_s13, 128  }
  0x36   : > { %s230_s15 = sadd.s32 (%p222_p12), 1, %s885_s0 }
  0x37   : > { %224 = sbr.rel (!%p222_p12) target bundleno = 50 (0x32), region = 186  ;;  %p698_p13 = scmp.ge.s32.totalorder (%p222_p12), %s230_s15, 2 }
  0x3c   : > { %234 = sbr.rel (%p698_p13) target bundleno = 83 (0x53), region = 80  ;;  %s235_s16 = ssub.s32 (!%p698_p13), 1, %s997_s26 }
  0x3d   : > { %s722_s17 = sshll.u32 (!%p698_p13), %s885_s0, 7  ;;  %s846_s19 = smov (!%p698_p13), 0  }
  0x3e   : > { %s723_s18 = sadd.s32 (!%p698_p13), 128, %s722_s17 }
  0x41 LB: >> { %s243_s21 = sadd.s32 %s848_s19, %s723_s18  ;;  %s700_s22 = sshll.u32 %s235_s16, 7  ;;  %s848_s19 = sphi %s846_s19, %s242_s19  }
  0x42   : >> { %s244_s23 = sld [smem:[#allocation5 + %s243_s21]]  ;;  %s247_s24 = sadd.s32 %s848_s19, %s700_s22 }
  0x43   : >> { %s248_s30 = scalar_lea.vmem [#allocation2], %s247_s24  ;;  %s249_s5 = scalar_lea.sflag [#allocation3], %s235_s16 }
  0x48   : >> { %s245_s28 = scalar_lea.vmem %s992_s3, %s244_s23 }
  0x49   : >> { %v268_v1 = vld [vmem:[%s245_s28] sm:$0x1] }
  0x4a   : >> { %269 = vst [vmem:[%s248_s30] sm:$0x1] %v268_v1 }
  0x4b   : >> { %295 = vsyncadd %s249_s5, 16  ;;  %s242_s19 = sadd.s32 1, %s848_s19  }
  0x4c   : >> { %p239_p0 = scmp.ge.s32.totalorder %s242_s19, 128  }
  0x4e   : > { %241 = sbr.rel (!%p239_p0) target bundleno = 65 (0x41), region = 197 }
  0x53 PF: > { %v330_v2 = vld [vmem:[%s991_s2] sm:$0xff]  ;;  %vm331_vm0 = vcmask 64512   ;;  %v315_v5 = vld [vmem:[%s896_s29 + $0x8] sm:$0xff]  ;;  %v316_v7 = vld [vmem:[%s896_s29 + $0x10] sm:$0xff]  ;;  %s701_s8 = sshll.u32 %s997_s26, 7 }
  0x54   : > { %v314_v3 = vld [vmem:[%s896_s29] sm:$0xff]  ;;  %741 = vmatprep.subr.mxu0 %v330_v2  ;;  %767 = vmatprep.subr.mxu1 %v330_v2  ;;  %v323_v6 = vld [vmem:[%s896_s29 + $0x48] sm:$0xff]  ;;  %v324_v8 = vld [vmem:[%s896_s29 + $0x50] sm:$0xff]  ;;  %s952_s9 = scalar_lea.vmem [#allocation2], %s701_s8 }
  0x55   : > { %v322_v4 = vld [vmem:[%s896_s29 + $0x40] sm:$0xff]  ;;  %742 = vmatpush3.msra.mxu0 %v330_v2  ;;  %768 = vmatpush3.msra.mxu1 %v330_v2  ;;  %v317_v9 = vld [vmem:[%s896_s29 + $0x18] sm:$0xff]  ;;  %v319_v13 = vld [vmem:[%s896_s29 + $0x28] sm:$0xff] }
  0x56   : > { %743 = vmatprep.mubr.msk.f32.mxu0 %vm331_vm0, %v314_v3  ;;  %755 = vmatprep.mubr.msk.f32.mxu1 %vm331_vm0, %v322_v4  ;;  %v325_v10 = vld [vmem:[%s896_s29 + $0x58] sm:$0xff]  ;;  %v318_v11 = vld [vmem:[%s896_s29 + $0x20] sm:$0xff]  ;;  %v327_v14 = vld [vmem:[%s896_s29 + $0x68] sm:$0xff] }
  0x57   : > { %744 = vmatmul.mubr.msk.f32.vlgmr.msra.gmra.mxu0 %vm331_vm0, %v315_v5  ;;  %756 = vmatmul.mubr.msk.f32.vlgmr.msra.gmra.mxu1 %vm331_vm0, %v323_v6  ;;  %v326_v12 = vld [vmem:[%s896_s29 + $0x60] sm:$0xff]  ;;  %v320_v15 = vld [vmem:[%s896_s29 + $0x30] sm:$0xff]  ;;  %v321_v17 = vld [vmem:[%s896_s29 + $0x38] sm:$0xff] }
  0x58   : > { %746 = vmatprep.mubr.msk.f32.mxu0 %vm331_vm0, %v316_v7  ;;  %758 = vmatprep.mubr.msk.f32.mxu1 %vm331_vm0, %v324_v8  ;;  %v328_v16 = vld [vmem:[%s896_s29 + $0x70] sm:$0xff]  ;;  %v329_v18 = vld [vmem:[%s896_s29 + $0x78] sm:$0xff]  ;;  %v299_v19 = vld [vmem:[%s952_s9 + $0x8] sm:$0xff] }
  0x59   : > { %v307_v21 = vld [vmem:[%s952_s9 + $0x48] sm:$0xff]  ;;  %v298_v25 = vld [vmem:[%s952_s9] sm:$0xff]  ;;  %v301_v33 = vld [vmem:[%s952_s9 + $0x18] sm:$0xff] }
  0x5a   : > { %v306_v27 = vld [vmem:[%s952_s9 + $0x40] sm:$0xff]  ;;  %v309_v35 = vld [vmem:[%s952_s9 + $0x58] sm:$0xff]  ;;  %v300_v41 = vld [vmem:[%s952_s9 + $0x10] sm:$0xff] }
  0x5b   : > { %747 = vmatmul.mubr.msk.f32.gmra.mxu0 %vm331_vm0, %v317_v9  ;;  %759 = vmatmul.mubr.msk.f32.gmra.mxu1 %vm331_vm0, %v325_v10  ;;  %v308_v43 = vld [vmem:[%s952_s9 + $0x50] sm:$0xff]  ;;  %v303_v49 = vld [vmem:[%s952_s9 + $0x28] sm:$0xff]  ;;  %v302_v57 = vld [vmem:[%s952_s9 + $0x20] sm:$0xff] }
  0x5c   : > { %749 = vmatprep.mubr.msk.f32.mxu0 %vm331_vm0, %v318_v11  ;;  %761 = vmatprep.mubr.msk.f32.mxu1 %vm331_vm0, %v326_v12  ;;  %v311_v51 = vld [vmem:[%s952_s9 + $0x68] sm:$0xff]  ;;  %v310_v59 = vld [vmem:[%s952_s9 + $0x60] sm:$0xff]  ;;  %v305_v1 = vld [vmem:[%s952_s9 + $0x38] sm:$0xff] }
  0x5d   : > { %v313_v3 = vld [vmem:[%s952_s9 + $0x78] sm:$0xff]  ;;  %v304_v9 = vld [vmem:[%s952_s9 + $0x30] sm:$0xff] }
  0x5e   : > { %v312_v11 = vld [vmem:[%s952_s9 + $0x70] sm:$0xff] }
  0x5f   : > { %750 = vmatmul.mubr.msk.f32.gmra.mxu0 %vm331_vm0, %v319_v13  ;;  %762 = vmatmul.mubr.msk.f32.gmra.mxu1 %vm331_vm0, %v327_v14 }
  0x60   : > { %752 = vmatprep.mubr.msk.f32.mxu0 %vm331_vm0, %v320_v15  ;;  %764 = vmatprep.mubr.msk.f32.mxu1 %vm331_vm0, %v328_v16 }
  0x63   : > { %753 = vmatmul.mubr.msk.f32.gmra.mxu0 %vm331_vm0, %v321_v17  ;;  %765 = vmatmul.mubr.msk.f32.gmra.mxu1 %vm331_vm0, %v329_v18 }
 0x117   : > { %v745_v20 = vpop.f32.mrf.mxu0  ;;  %v757_v22 = vpop.f32.mrf.mxu1 }
 0x118   : > { %v526_v23 = vmul.f32 2.0, %v745_v20  ;;  %v534_v24 = vmul.f32 2.0, %v757_v22 }
 0x119   : > { %v446_v26 = vpop.f32.mrf.mxu0  ;;  %v486_v28 = vpop.f32.mrf.mxu1 }
 0x11a   : > { %v542_v29 = vadd.f32 %v526_v23, %v299_v19  ;;  %v550_v30 = vadd.f32 %v534_v24, %v307_v21  ;;  %v525_v31 = vmul.f32 2.0, %v446_v26  ;;  %v533_v32 = vmul.f32 2.0, %v486_v28 }
 0x11b   : > { %v748_v34 = vpop.f32.mrf.mxu0  ;;  %v760_v36 = vpop.f32.mrf.mxu1 }
 0x11c   : > { %558 = vst [vmem:[%s901_s6 + $0x8] sm:$0xff] %v542_v29  ;;  %566 = vst [vmem:[%s901_s6 + $0x48] sm:$0xff] %v550_v30  ;;  %v541_v37 = vadd.f32 %v525_v31, %v298_v25  ;;  %v549_v38 = vadd.f32 %v533_v32, %v306_v27  ;;  %v528_v39 = vmul.f32 2.0, %v748_v34  ;;  %v536_v40 = vmul.f32 2.0, %v760_v36 }
 0x11d   : > { %v456_v42 = vpop.f32.mrf.mxu0  ;;  %v496_v44 = vpop.f32.mrf.mxu1 }
 0x11e   : > { %557 = vst [vmem:[%s901_s6] sm:$0xff] %v541_v37  ;;  %565 = vst [vmem:[%s901_s6 + $0x40] sm:$0xff] %v549_v38  ;;  %v544_v45 = vadd.f32 %v528_v39, %v301_v33  ;;  %v552_v46 = vadd.f32 %v536_v40, %v309_v35  ;;  %v527_v47 = vmul.f32 2.0, %v456_v42  ;;  %v535_v48 = vmul.f32 2.0, %v496_v44 }
 0x11f   : > { %v751_v50 = vpop.f32.mrf.mxu0  ;;  %v763_v52 = vpop.f32.mrf.mxu1 }
 0x120   : > { %560 = vst [vmem:[%s901_s6 + $0x18] sm:$0xff] %v544_v45  ;;  %568 = vst [vmem:[%s901_s6 + $0x58] sm:$0xff] %v552_v46  ;;  %v543_v53 = vadd.f32 %v527_v47, %v300_v41  ;;  %v551_v54 = vadd.f32 %v535_v48, %v308_v43  ;;  %v530_v55 = vmul.f32 2.0, %v751_v50  ;;  %v538_v56 = vmul.f32 2.0, %v763_v52 }
 0x121   : > { %v466_v58 = vpop.f32.mrf.mxu0  ;;  %v506_v60 = vpop.f32.mrf.mxu1 }
 0x122   : > { %559 = vst [vmem:[%s901_s6 + $0x10] sm:$0xff] %v543_v53  ;;  %567 = vst [vmem:[%s901_s6 + $0x50] sm:$0xff] %v551_v54  ;;  %v546_v61 = vadd.f32 %v530_v55, %v303_v49  ;;  %v554_v62 = vadd.f32 %v538_v56, %v311_v51  ;;  %v529_v63 = vmul.f32 2.0, %v466_v58  ;;  %v537_v0 = vmul.f32 2.0, %v506_v60 }
 0x123   : > { %v754_v2 = vpop.f32.mrf.mxu0  ;;  %v766_v4 = vpop.f32.mrf.mxu1 }
 0x124   : > { %562 = vst [vmem:[%s901_s6 + $0x28] sm:$0xff] %v546_v61  ;;  %570 = vst [vmem:[%s901_s6 + $0x68] sm:$0xff] %v554_v62  ;;  %v545_v5 = vadd.f32 %v529_v63, %v302_v57  ;;  %v553_v6 = vadd.f32 %v537_v0, %v310_v59  ;;  %v532_v7 = vmul.f32 2.0, %v754_v2  ;;  %v540_v8 = vmul.f32 2.0, %v766_v4 }
 0x125   : > { %v476_v10 = vpop.f32.mrf.mxu0  ;;  %v516_v12 = vpop.f32.mrf.mxu1 }
 0x126   : > { %561 = vst [vmem:[%s901_s6 + $0x20] sm:$0xff] %v545_v5  ;;  %569 = vst [vmem:[%s901_s6 + $0x60] sm:$0xff] %v553_v6  ;;  %v548_v13 = vadd.f32 %v532_v7, %v305_v1  ;;  %v556_v14 = vadd.f32 %v540_v8, %v313_v3  ;;  %v531_v15 = vmul.f32 2.0, %v476_v10  ;;  %v539_v16 = vmul.f32 2.0, %v516_v12 }
 0x128   : > { %564 = vst [vmem:[%s901_s6 + $0x38] sm:$0xff] %v548_v13  ;;  %572 = vst [vmem:[%s901_s6 + $0x78] sm:$0xff] %v556_v14  ;;  %v547_v17 = vadd.f32 %v531_v15, %v304_v9  ;;  %v555_v18 = vadd.f32 %v539_v16, %v312_v11 }
 0x12a   : > { %563 = vst [vmem:[%s901_s6 + $0x30] sm:$0xff] %v547_v17  ;;  %571 = vst [vmem:[%s901_s6 + $0x70] sm:$0xff] %v555_v18 }
 0x12b PF: > { %s20_s20 = sadd.s32 1, %s836_s20  }
 0x12c   : > { %p17_p1 = scmp.ge.s32.totalorder %s20_s20, 4  }
 0x12e   :  { %19 = sbr.rel (!%p17_p1) target bundleno = 16 (0x10), region = 208 }
 0x133   :  { %595 = vsyncmov [#allocation3] }
 0x136   :  { %s596_s26 = vpop.sfrf %595 }
 0x137   :  { %p720_p2 = scmp.ne.s32.totalorder %s596_s26, 0 }
 0x139   :  { %600 = shalt.err (%p720_p2)  }
 0x13a   :  { %602 = vsyncmov [#allocation3 + $0x1] }
 0x13d   :  { %s603_s29 = vpop.sfrf %602 }
 0x13e   :  { %p721_p3 = scmp.ne.s32.totalorder %s603_s29, 0 }
 0x140   :  { %607 = shalt.err (%p721_p3)  }

</bundles_post_ra>
